<compile_context>
chip_gen: v6e
topology: v6e:2x2x1
jax: 0.10.0
libtpu: 0.0.40
codegen_flags: <defaults>
</compile_context>

<pallas_src>
import jax
import jax.numpy as jnp
from jax.experimental import pallas as pl
from jax.experimental.pallas import tpu as pltpu


def _round_up(x, m):
    return ((x + m - 1) // m) * m


def policy_kernel(s_ref, w1_ref, b1_ref, w2_ref, b2_ref, w3_ref, b3_ref,
                  probs_ref, logprobs_ref):
    # Feature-major tiles: s_ref (state_dim, TILE_B), outputs (n_actions, TILE_B).
    x = s_ref[...]                                                 # (K, TILE_B)

    # ---- layer 1 (MXU): (128, K) @ (K, TILE_B) ----
    h1 = jnp.dot(w1_ref[...], x, preferred_element_type=jnp.float32) + b1_ref[...]
    h1 = jnp.maximum(h1, 0.0)

    # ---- layer 2 (MXU): (64, 128) @ (128, TILE_B) ----
    h2 = jnp.dot(w2_ref[...], h1, preferred_element_type=jnp.float32) + b2_ref[...]
    h2 = jnp.maximum(h2, 0.0)

    # ---- output layer (MXU): (n_actions, 64) @ (64, TILE_B) ----
    logits = jnp.dot(w3_ref[...], h2, preferred_element_type=jnp.float32) + b3_ref[...]

    # TODO(synk): PyTorch module raises ValueError on NaN/Inf logits; there is
    # no clean in-kernel equivalent of raising an exception, so it is omitted.

    # ---- numerically-stable softmax / log_softmax along axis 0 (actions) ----
    # axis 0 is the sublane axis with only n_actions useful rows, so these
    # reductions are a couple of VPU elementwise ops per lane (per batch elem).
    m = jnp.max(logits, axis=0, keepdims=True)
    z = logits - m
    e = jnp.exp(z)                                    # EUP
    denom = jnp.sum(e, axis=0, keepdims=True)
    log_denom = jnp.log(denom)                        # EUP
    inv_denom = pl.reciprocal(denom, approx=False)    # EUP (exact -> 1e-5 tol holds)

    logprobs_ref[...] = z - log_denom
    probs_ref[...] = e * inv_denom


def policy_forward_t(s_t, params, tile_b=1024):
    """Feature-major forward pass.

    s_t: (state_dim, B) float32  (batch on lanes)
    params: w1 (128, state_dim), b1 (128, 1), w2 (64, 128), b2 (64, 1),
            w3 (n_actions, 64), b3 (n_actions, 1)   -- PyTorch weight layout.
    returns (probs_t, logprobs_t), each (n_actions, B) float32.
    """
    state_dim, B = s_t.shape
    h1_dim = params["w1"].shape[0]
    h2_dim = params["w2"].shape[0]
    n_actions = params["w3"].shape[0]

    # Batch tile selection:
    #  * B <= 128: one full-extent block (lane dim == full array dim is legal).
    #  * otherwise: lane-aligned (multiple of 128) tile, capped so the grid has
    #    at least 2 steps (v7x megacore), default up to `tile_b` lanes.
    if B <= 128:
        tb = B
    else:
        tb = min(tile_b, _round_up(pl.cdiv(B, 2), 128))
        tb = max(tb, 128)
    grid = (pl.cdiv(B, tb),)

    # Batch tiles stream through VMEM (double-buffered); weights/biases use a
    # constant index_map so they are DMA'd once and stay resident.
    in_specs = [
        pl.BlockSpec((state_dim, tb), lambda i: (0, i)),        # s (feature-major)
        pl.BlockSpec((h1_dim, state_dim), lambda i: (0, 0)),    # w1
        pl.BlockSpec((h1_dim, 1), lambda i: (0, 0)),            # b1
        pl.BlockSpec((h2_dim, h1_dim), lambda i: (0, 0)),       # w2
        pl.BlockSpec((h2_dim, 1), lambda i: (0, 0)),            # b2
        pl.BlockSpec((n_actions, h2_dim), lambda i: (0, 0)),    # w3
        pl.BlockSpec((n_actions, 1), lambda i: (0, 0)),         # b3
    ]
    out_specs = (
        pl.BlockSpec((n_actions, tb), lambda i: (0, i)),        # probs^T
        pl.BlockSpec((n_actions, tb), lambda i: (0, i)),        # logprobs^T
    )
    out_shape = (
        jax.ShapeDtypeStruct((n_actions, B), jnp.float32),
        jax.ShapeDtypeStruct((n_actions, B), jnp.float32),
    )

    param_bytes = sum(int(p.size) * 4 for p in params.values())
    cost = pl.CostEstimate(
        flops=2 * B * (state_dim * h1_dim + h1_dim * h2_dim + h2_dim * n_actions),
        transcendentals=B * (n_actions + 2),  # exp per action + log + reciprocal
        bytes_accessed=4 * B * (state_dim + 2 * n_actions) + param_bytes,
    )

    return pl.pallas_call(
        policy_kernel,
        out_shape=out_shape,
        grid=grid,
        in_specs=in_specs,
        out_specs=out_specs,
        compiler_params=pltpu.CompilerParams(
            dimension_semantics=("parallel",)),  # batch tiles shard across TCs on v7x
        cost_estimate=cost,
    )(s_t, params["w1"], params["b1"], params["w2"], params["b2"],
      params["w3"], params["b3"])


def policy_forward(s, params, tile_b=1024):
    """PyTorch-layout convenience wrapper.

    s: (B, state_dim) float32  ->  returns (probs, logprobs), each (B, n_actions).
    The in/out transposes touch only B*(state_dim + 2*n_actions) floats; callers
    that already keep rollouts feature-major should call policy_forward_t directly.
    """
    probs_t, logprobs_t = policy_forward_t(s.T, params, tile_b=tile_b)
    return probs_t.T, logprobs_t.T


def init_params(key, state_dim, n_actions):
    """Deterministic synthetic init (uniform, like PyTorch Linear default).

    Weights are (out_features, in_features) == PyTorch's weight layout;
    biases are (out_features, 1).
    """
    k1, k2, k3, k4, k5, k6 = jax.random.split(key, 6)

    def lin(kw, kb, fan_in, fan_out):
        bound = 1.0 / jnp.sqrt(fan_in)
        w = jax.random.uniform(kw, (fan_out, fan_in), jnp.float32, -bound, bound)
        b = jax.random.uniform(kb, (fan_out, 1), jnp.float32, -bound, bound)
        return w, b

    w1, b1 = lin(k1, k2, state_dim, 128)
    w2, b2 = lin(k3, k4, 128, 64)
    w3, b3 = lin(k5, k6, 64, n_actions)
    return dict(w1=w1, b1=b1, w2=w2, b2=b2, w3=w3, b3=b3)


def _reference(s, params):
    h1 = jnp.maximum(s @ params["w1"].T + params["b1"].T, 0.0)
    h2 = jnp.maximum(h1 @ params["w2"].T + params["b2"].T, 0.0)
    logits = h2 @ params["w3"].T + params["b3"].T
    return jax.nn.softmax(logits, axis=-1), jax.nn.log_softmax(logits, axis=-1)


if __name__ == "__main__":
    key = jax.random.PRNGKey(0)
    k_params, k_small, k_big = jax.random.split(key, 3)

    state_dim = 4     # e.g. CartPole-style observation
    n_actions = 2
    params = init_params(k_params, state_dim, n_actions)

    # small batch: single full-extent block (grid=(1,))
    s_small = jax.random.normal(k_small, (8, state_dim), jnp.float32)
    probs, logprobs = policy_forward(s_small, params)
    probs, logprobs = jax.block_until_ready((probs, logprobs))
    probs_ref, logprobs_ref = _reference(s_small, params)
    assert probs.shape == (8, n_actions)
    assert jnp.allclose(probs, probs_ref, atol=1e-5)
    assert jnp.allclose(logprobs, logprobs_ref, atol=1e-5)
    assert jnp.allclose(jnp.sum(probs, axis=-1), 1.0, atol=1e-5)

    # larger, non-multiple batch: exercises the >=2-step grid + ragged last block
    s_big = jax.random.normal(k_big, (600, state_dim), jnp.float32)
    probs_b, logprobs_b = policy_forward(s_big, params)
    probs_b, logprobs_b = jax.block_until_ready((probs_b, logprobs_b))
    probs_b_ref, logprobs_b_ref = _reference(s_big, params)
    assert probs_b.shape == (600, n_actions)
    assert jnp.allclose(probs_b, probs_b_ref, atol=1e-5)
    assert jnp.allclose(logprobs_b, logprobs_b_ref, atol=1e-5)

    print("KERNEL_OK")
</pallas_src>

<mosaic_0001>
module attributes {stable_mosaic.version = 11 : i64} {
  func.func @policy_kernel(%arg0: i32, %arg1: memref<4x8xf32, #tpu.memory_space<vmem>>, %arg2: memref<128x4xf32, #tpu.memory_space<vmem>>, %arg3: memref<128x1xf32, #tpu.memory_space<vmem>>, %arg4: memref<64x128xf32, #tpu.memory_space<vmem>>, %arg5: memref<64x1xf32, #tpu.memory_space<vmem>>, %arg6: memref<2x64xf32, #tpu.memory_space<vmem>>, %arg7: memref<2x1xf32, #tpu.memory_space<vmem>>, %arg8: memref<2x8xf32, #tpu.memory_space<vmem>>, %arg9: memref<2x8xf32, #tpu.memory_space<vmem>>) attributes {dimension_semantics = [#tpu.dimension_semantics<parallel>], iteration_bounds = array<i64: 1>, scalar_prefetch = 0 : i64, scratch_operands = 0 : i64, tpu.core_type = #tpu.core_type<tc>, window_params = [{transform_indices = @transform_0, window_bounds = array<i64: 4, 8>}, {pipeline_mode = #tpu.pipeline_mode<synchronous>, transform_indices = @transform_1, window_bounds = array<i64: 128, 4>}, {pipeline_mode = #tpu.pipeline_mode<synchronous>, transform_indices = @transform_2, window_bounds = array<i64: 128, 1>}, {pipeline_mode = #tpu.pipeline_mode<synchronous>, transform_indices = @transform_3, window_bounds = array<i64: 64, 128>}, {pipeline_mode = #tpu.pipeline_mode<synchronous>, transform_indices = @transform_4, window_bounds = array<i64: 64, 1>}, {pipeline_mode = #tpu.pipeline_mode<synchronous>, transform_indices = @transform_5, window_bounds = array<i64: 2, 64>}, {pipeline_mode = #tpu.pipeline_mode<synchronous>, transform_indices = @transform_6, window_bounds = array<i64: 2, 1>}, {transform_indices = @transform_7, window_bounds = array<i64: 2, 8>}, {transform_indices = @transform_8, window_bounds = array<i64: 2, 8>}]} {
    %c0 = arith.constant 0 : index
    %c0_0 = arith.constant 0 : index
    %0 = vector.load %arg1[%c0, %c0_0] : memref<4x8xf32, #tpu.memory_space<vmem>>, vector<4x8xf32>
    %c0_1 = arith.constant 0 : index
    %c0_2 = arith.constant 0 : index
    %1 = vector.load %arg2[%c0_1, %c0_2] : memref<128x4xf32, #tpu.memory_space<vmem>>, vector<128x4xf32>
    %cst = arith.constant dense<0.000000e+00> : vector<128x8xf32>
    %2 = tpu.matmul %1, %0, %cst {dimension_numbers = #tpu.dot_dimension_numbers<[1], [0], [0], [1], [0, 0, 1, 1], [], []>} : vector<128x4xf32>, vector<4x8xf32>, vector<128x8xf32> -> vector<128x8xf32>
    %c0_3 = arith.constant 0 : index
    %c0_4 = arith.constant 0 : index
    %3 = vector.load %arg3[%c0_3, %c0_4] : memref<128x1xf32, #tpu.memory_space<vmem>>, vector<128x1xf32>
    %4 = vector.broadcast %3 : vector<128x1xf32> to vector<128x8xf32>
    %5 = arith.addf %2, %4 : vector<128x8xf32>
    %cst_5 = arith.constant 0.000000e+00 : f32
    %6 = vector.broadcast %cst_5 : f32 to vector<128x8xf32>
    %7 = arith.maximumf %5, %6 : vector<128x8xf32>
    %c0_6 = arith.constant 0 : index
    %c0_7 = arith.constant 0 : index
    %8 = vector.load %arg4[%c0_6, %c0_7] : memref<64x128xf32, #tpu.memory_space<vmem>>, vector<64x128xf32>
    %cst_8 = arith.constant dense<0.000000e+00> : vector<64x8xf32>
    %9 = tpu.matmul %8, %7, %cst_8 {dimension_numbers = #tpu.dot_dimension_numbers<[1], [0], [0], [1], [0, 0, 1, 1], [], []>} : vector<64x128xf32>, vector<128x8xf32>, vector<64x8xf32> -> vector<64x8xf32>
    %c0_9 = arith.constant 0 : index
    %c0_10 = arith.constant 0 : index
    %10 = vector.load %arg5[%c0_9, %c0_10] : memref<64x1xf32, #tpu.memory_space<vmem>>, vector<64x1xf32>
    %11 = vector.broadcast %10 : vector<64x1xf32> to vector<64x8xf32>
    %12 = arith.addf %9, %11 : vector<64x8xf32>
    %cst_11 = arith.constant 0.000000e+00 : f32
    %13 = vector.broadcast %cst_11 : f32 to vector<64x8xf32>
    %14 = arith.maximumf %12, %13 : vector<64x8xf32>
    %c0_12 = arith.constant 0 : index
    %c0_13 = arith.constant 0 : index
    %15 = vector.load %arg6[%c0_12, %c0_13] : memref<2x64xf32, #tpu.memory_space<vmem>>, vector<2x64xf32>
    %cst_14 = arith.constant dense<0.000000e+00> : vector<2x8xf32>
    %16 = tpu.matmul %15, %14, %cst_14 {dimension_numbers = #tpu.dot_dimension_numbers<[1], [0], [0], [1], [0, 0, 1, 1], [], []>} : vector<2x64xf32>, vector<64x8xf32>, vector<2x8xf32> -> vector<2x8xf32>
    %c0_15 = arith.constant 0 : index
    %c0_16 = arith.constant 0 : index
    %17 = vector.load %arg7[%c0_15, %c0_16] : memref<2x1xf32, #tpu.memory_space<vmem>>, vector<2x1xf32>
    %18 = vector.broadcast %17 : vector<2x1xf32> to vector<2x8xf32>
    %19 = arith.addf %16, %18 : vector<2x8xf32>
    %cst_17 = arith.constant dense<0xFF800000> : vector<8xf32>
    %20 = vector.multi_reduction <maximumf>, %19, %cst_17 [0] : vector<2x8xf32> to vector<8xf32>
    %21 = vector.shape_cast %20 : vector<8xf32> to vector<1x8xf32>
    %22 = vector.broadcast %21 : vector<1x8xf32> to vector<2x8xf32>
    %23 = arith.subf %19, %22 : vector<2x8xf32>
    %24 = math.exp %23 : vector<2x8xf32>
    %cst_18 = arith.constant dense<0.000000e+00> : vector<8xf32>
    %25 = vector.multi_reduction <add>, %24, %cst_18 [0] : vector<2x8xf32> to vector<8xf32>
    %26 = vector.shape_cast %25 : vector<8xf32> to vector<1x8xf32>
    %27 = math.log %26 : vector<1x8xf32>
    %28 = tpu.reciprocal %26 : vector<1x8xf32> -> vector<1x8xf32>
    %29 = vector.broadcast %27 : vector<1x8xf32> to vector<2x8xf32>
    %30 = arith.subf %23, %29 : vector<2x8xf32>
    %c0_19 = arith.constant 0 : index
    %c0_20 = arith.constant 0 : index
    %31 = vector.load %arg9[%c0_19, %c0_20] : memref<2x8xf32, #tpu.memory_space<vmem>>, vector<2x8xf32>
    tpu.vector_store %arg9[%c0_19, %c0_20], %30 {strides = array<i32>} : memref<2x8xf32, #tpu.memory_space<vmem>>, vector<2x8xf32>,
    %32 = vector.broadcast %28 : vector<1x8xf32> to vector<2x8xf32>
    %33 = arith.mulf %24, %32 : vector<2x8xf32>
    %c0_21 = arith.constant 0 : index
    %c0_22 = arith.constant 0 : index
    %34 = vector.load %arg8[%c0_21, %c0_22] : memref<2x8xf32, #tpu.memory_space<vmem>>, vector<2x8xf32>
    tpu.vector_store %arg8[%c0_21, %c0_22], %33 {strides = array<i32>} : memref<2x8xf32, #tpu.memory_space<vmem>>, vector<2x8xf32>,
    return
  }
  func.func @transform_0(%arg0: i32) -> (i32, i32) {
    %c0_i32 = arith.constant 0 : i32
    %c0_i32_0 = arith.constant 0 : i32
    return %c0_i32, %arg0 : i32, i32
  }
  func.func @transform_1(%arg0: i32) -> (i32, i32) {
    %c0_i32 = arith.constant 0 : i32
    %c0_i32_0 = arith.constant 0 : i32
    %c0_i32_1 = arith.constant 0 : i32
    return %c0_i32, %c0_i32_0 : i32, i32
  }
  func.func @transform_2(%arg0: i32) -> (i32, i32) {
    %c0_i32 = arith.constant 0 : i32
    %c0_i32_0 = arith.constant 0 : i32
    %c0_i32_1 = arith.constant 0 : i32
    return %c0_i32, %c0_i32_0 : i32, i32
  }
  func.func @transform_3(%arg0: i32) -> (i32, i32) {
    %c0_i32 = arith.constant 0 : i32
    %c0_i32_0 = arith.constant 0 : i32
    %c0_i32_1 = arith.constant 0 : i32
    return %c0_i32, %c0_i32_0 : i32, i32
  }
  func.func @transform_4(%arg0: i32) -> (i32, i32) {
    %c0_i32 = arith.constant 0 : i32
    %c0_i32_0 = arith.constant 0 : i32
    %c0_i32_1 = arith.constant 0 : i32
    return %c0_i32, %c0_i32_0 : i32, i32
  }
  func.func @transform_5(%arg0: i32) -> (i32, i32) {
    %c0_i32 = arith.constant 0 : i32
    %c0_i32_0 = arith.constant 0 : i32
    %c0_i32_1 = arith.constant 0 : i32
    return %c0_i32, %c0_i32_0 : i32, i32
  }
  func.func @transform_6(%arg0: i32) -> (i32, i32) {
    %c0_i32 = arith.constant 0 : i32
    %c0_i32_0 = arith.constant 0 : i32
    %c0_i32_1 = arith.constant 0 : i32
    return %c0_i32, %c0_i32_0 : i32, i32
  }
  func.func @transform_7(%arg0: i32) -> (i32, i32) {
    %c0_i32 = arith.constant 0 : i32
    %c0_i32_0 = arith.constant 0 : i32
    return %c0_i32, %arg0 : i32, i32
  }
  func.func @transform_8(%arg0: i32) -> (i32, i32) {
    %c0_i32 = arith.constant 0 : i32
    %c0_i32_0 = arith.constant 0 : i32
    return %c0_i32, %arg0 : i32, i32
  }
}

</mosaic_0001>

<bundles_post_ra>
// kernel: tpu_custom_call.1
= control target key start
LH: loop header
LB: loop body
LE: loop exit
PB: predicated region body
PF: predicated region fallthrough
CT: control target
= control target key end

     0   :  { %14 = vsyncpa [#allocation3], 0  ;;  %vm192_vm0 = vcmask 1043456   ;;  %vm143_vm1 = vcmask 31744   ;;  %v874_v4 = vmov 0   ;;  %s1115_s0 = inlined_call_operand.vmem [shape: f32[4,8], index: 0, kind: input, shape index: {}]   ;;  %s1116_s1 = inlined_call_operand.vmem [shape: f32[128,4], index: 1, kind: input, shape index: {}]   ;;  %s1117_s2 = inlined_call_operand.vmem [shape: f32[128,1], index: 2, kind: input, shape index: {}]   ;;  %s1118_s3 = inlined_call_operand.vmem [shape: f32[64,128], index: 3, kind: input, shape index: {}]   ;;  %s1119_s4 = inlined_call_operand.vmem [shape: f32[64,1], index: 4, kind: input, shape index: {}]   ;;  %s1120_s5 = inlined_call_operand.vmem [shape: f32[2,64], index: 5, kind: input, shape index: {}]   ;;  %s1121_s6 = inlined_call_operand.vmem [shape: f32[2,1], index: 6, kind: input, shape index: {}]   ;;  %s1122_s7 = inlined_call_operand.hbm [shape: f32[2,8], index: 7, kind: output, shape index: {0}]   ;;  %s1123_s8 = inlined_call_operand.hbm [shape: f32[2,8], index: 8, kind: output, shape index: {1}]  }
   0x1   :  { %v30_v0 = vld [vmem:[%s1115_s0] sm:$0xf]  ;;  %v32_v2 = vld [vmem:[%s1116_s1 + $0x8] sm:$0xff]  ;;  %v33_v3 = vld [vmem:[%s1116_s1 + $0x10] sm:$0xff]  ;;  %822 = vset.pattern.permute.xlu0 %v874_v4  ;;  %823 = vset.pattern.permute.xlu1 %v874_v4 }
   0x2   :  { %v31_v1 = vld [vmem:[%s1116_s1] sm:$0xff]  ;;  %728 = vmatprep.subr.msk.mxu0 %vm192_vm0, %v30_v0  ;;  %v34_v5 = vld [vmem:[%s1116_s1 + $0x18] sm:$0xff]  ;;  %v60_v8 = vld [vmem:[%s1117_s2 + $0x68] sm:$0xff] }
   0x3   :  { %730 = vmatprep.mubr.msk.f32.mxu0 %vm143_vm1, %v31_v1  ;;  %729 = vmatpush3.msk.msra.mxu0 %vm192_vm0, %v30_v0  ;;  %v35_v6 = vld [vmem:[%s1116_s1 + $0x20] sm:$0xff]  ;;  %v62_v7 = vld [vmem:[%s1117_s2 + $0x78] sm:$0xff]  ;;  %v61_v9 = vld [vmem:[%s1117_s2 + $0x70] sm:$0xff] }
   0x4   :  { %731 = vmatmul.mubr.msk.f32.vlgmr.msra.gmra.mxu0 %vm143_vm1, %v32_v2  ;;  %140 = vperm.xlu0 %822, %v62_v7   ;;  %v36_v10 = vld [vmem:[%s1116_s1 + $0x28] sm:$0xff]  ;;  %v59_v11 = vld [vmem:[%s1117_s2 + $0x60] sm:$0xff]  ;;  %v37_v12 = vld [vmem:[%s1116_s1 + $0x30] sm:$0xff] }
   0x5   :  { %733 = vmatprep.mubr.msk.f32.mxu0 %vm143_vm1, %v33_v3  ;;  %130 = vperm.xlu1 %823, %v60_v8   ;;  %v58_v13 = vld [vmem:[%s1117_s2 + $0x58] sm:$0xff]  ;;  %v57_v15 = vld [vmem:[%s1117_s2 + $0x50] sm:$0xff]  ;;  %v39_v16 = vld [vmem:[%s1116_s1 + $0x40] sm:$0xff] }
   0x6   :  { %v38_v14 = vld [vmem:[%s1116_s1 + $0x38] sm:$0xff] }
   0x8   :  { %734 = vmatmul.mubr.msk.f32.gmra.mxu0 %vm143_vm1, %v34_v5  ;;  %135 = vperm.xlu0 %822, %v61_v9  }
   0x9   :  { %736 = vmatprep.mubr.msk.f32.mxu0 %vm143_vm1, %v35_v6  ;;  %125 = vperm.xlu1 %823, %v59_v11  }
   0xc   :  { %737 = vmatmul.mubr.msk.f32.gmra.mxu0 %vm143_vm1, %v36_v10  ;;  %120 = vperm.xlu0 %822, %v58_v13  }
   0xd   :  { %739 = vmatprep.mubr.msk.f32.mxu0 %vm143_vm1, %v37_v12 }
   0xe   :  { %15 = vsyncpa [#allocation5], 0  ;;  %115 = vperm.xlu1 %823, %v57_v15   ;;  %v56_v17 = vld [vmem:[%s1117_s2 + $0x48] sm:$0xff]  ;;  %v55_v19 = vld [vmem:[%s1117_s2 + $0x40] sm:$0xff]  ;;  %vm876_vm2 = vmmov 0   ;;  %vm533_vm3 = vcmask 523264  }
   0xf   :  { %v40_v18 = vld [vmem:[%s1116_s1 + $0x48] sm:$0xff]  ;;  %v41_v20 = vld [vmem:[%s1116_s1 + $0x50] sm:$0xff]  ;;  %v54_v21 = vld [vmem:[%s1117_s2 + $0x38] sm:$0xff]  ;;  %vm607_vm4 = vcmask 58368   ;;  %s878_s9 = smov [#allocation4]  }
  0x10   :  { %740 = vmatmul.mubr.msk.f32.gmra.mxu0 %vm143_vm1, %v38_v14  ;;  %110 = vperm.xlu0 %822, %v56_v17   ;;  %v42_v22 = vld [vmem:[%s1116_s1 + $0x58] sm:$0xff]  ;;  %v53_v23 = vld [vmem:[%s1117_s2 + $0x30] sm:$0xff]  ;;  %v43_v24 = vld [vmem:[%s1116_s1 + $0x60] sm:$0xff]  ;;  %s648_s10 = sshll.u32 %s878_s9, 4  ;;  %s649_s10 = int_to_ptr.vmem [resolvable:$true] %s648_s10 }
  0x11   :  { %742 = vmatprep.mubr.msk.f32.mxu0 %vm143_vm1, %v39_v16  ;;  %v52_v25 = vld [vmem:[%s1117_s2 + $0x28] sm:$0xff]  ;;  %v51_v27 = vld [vmem:[%s1117_s2 + $0x20] sm:$0xff]  ;;  %v45_v28 = vld [vmem:[%s1116_s1 + $0x70] sm:$0xff] }
  0x12   :  { %105 = vperm.xlu1 %823, %v55_v19   ;;  %v44_v26 = vld [vmem:[%s1116_s1 + $0x68] sm:$0xff]  ;;  %v50_v29 = vld [vmem:[%s1117_s2 + $0x18] sm:$0xff]  ;;  %v49_v31 = vld [vmem:[%s1117_s2 + $0x10] sm:$0xff] }
  0x13   :  { %v46_v30 = vld [vmem:[%s1116_s1 + $0x78] sm:$0xff]  ;;  %v48_v32 = vld [vmem:[%s1117_s2 + $0x8] sm:$0xff]  ;;  %v47_v33 = vld [vmem:[%s1117_s2] sm:$0xff] }
  0x14   :  { %743 = vmatmul.mubr.msk.f32.gmra.mxu0 %vm143_vm1, %v40_v18  ;;  %100 = vperm.xlu0 %822, %v54_v21   ;;  %v372_v34 = vld [vmem:[%s1119_s4 + $0x38] sm:$0xff]  ;;  %v371_v35 = vld [vmem:[%s1119_s4 + $0x30] sm:$0xff]  ;;  %v370_v36 = vld [vmem:[%s1119_s4 + $0x28] sm:$0xff] }
  0x15   :  { %745 = vmatprep.mubr.msk.f32.mxu0 %vm143_vm1, %v41_v20  ;;  %v369_v37 = vld [vmem:[%s1119_s4 + $0x20] sm:$0xff]  ;;  %v368_v38 = vld [vmem:[%s1119_s4 + $0x18] sm:$0xff]  ;;  %v367_v39 = vld [vmem:[%s1119_s4 + $0x10] sm:$0xff] }
  0x16   :  { %95 = vperm.xlu1 %823, %v53_v23   ;;  %v366_v40 = vld [vmem:[%s1119_s4 + $0x8] sm:$0xff]  ;;  %v365_v41 = vld [vmem:[%s1119_s4] sm:$0xff] }
  0x17   :  { %v527_v42 = vld [vmem:[%s1121_s6] sm:$0x3] }
  0x18   :  { %746 = vmatmul.mubr.msk.f32.gmra.mxu0 %vm143_vm1, %v42_v22  ;;  %90 = vperm.xlu0 %822, %v52_v25   ;;  %v357_v43 = vld [vmem:[%s1118_s3] sm:$0xff] }
  0x19   :  { %748 = vmatprep.mubr.msk.f32.mxu0 %vm143_vm1, %v43_v24  ;;  %786 = vmatprep.mubr.f32.mxu1 %v357_v43 }
  0x1a   :  { %85 = vperm.xlu1 %823, %v51_v27  }
  0x1c   :  { %749 = vmatmul.mubr.msk.f32.gmra.mxu0 %vm143_vm1, %v44_v26  ;;  %80 = vperm.xlu0 %822, %v50_v29  }
  0x1d   :  { %751 = vmatprep.mubr.msk.f32.mxu0 %vm143_vm1, %v45_v28 }
  0x1e   :  { %75 = vperm.xlu1 %823, %v49_v31  }
  0x20   :  { %752 = vmatmul.mubr.msk.f32.gmra.mxu0 %vm143_vm1, %v46_v30  ;;  %70 = vperm.xlu0 %822, %v48_v32  }
  0x22   :  { %65 = vperm.xlu1 %823, %v47_v33  }
  0x24   :  { %410 = vperm.xlu0 %822, %v372_v34  }
  0x26   :  { %405 = vperm.xlu1 %823, %v371_v35  }
  0x28   :  { %400 = vperm.xlu0 %822, %v370_v36  }
  0x2a   :  { %395 = vperm.xlu1 %823, %v369_v37  }
  0x2c   :  { %390 = vperm.xlu0 %822, %v368_v38  }
  0x2e   :  { %385 = vperm.xlu1 %823, %v367_v39  }
  0x30   :  { %380 = vperm.xlu0 %822, %v366_v40  }
  0x32   :  { %375 = vperm.xlu1 %823, %v365_v41  }
  0x34   :  { %530 = vperm.xlu0 %822, %v527_v42  }
  0x7f   :  { %v141_v49 = vpop.permute.xlu0 %140 }
  0x80   :  { %v131_v51 = vpop.permute.xlu1 %130 }
  0x83   :  { %v136_v54 = vpop.permute.xlu0 %135 }
  0x84   :  { %v126_v56 = vpop.permute.xlu1 %125 }
  0x87   :  { %v121_v59 = vpop.permute.xlu0 %120 }
  0x89   :  { %v116_v61 = vpop.permute.xlu1 %115 }
  0x8b   :  { %v111_v0 = vpop.permute.xlu0 %110 }
  0x8d   :  { %v106_v3 = vpop.permute.xlu1 %105 }
  0x8f   :  { %v101_v10 = vpop.permute.xlu0 %100 }
  0x91   :  { %v96_v13 = vpop.permute.xlu1 %95 }
  0x93   :  { %v91_v18 = vpop.permute.xlu0 %90 }
  0x95   :  { %v86_v21 = vpop.permute.xlu1 %85 }
  0x97   :  { %v81_v26 = vpop.permute.xlu0 %80 }
  0x99   :  { %v76_v29 = vpop.permute.xlu1 %75 }
  0x9b   :  { %v71_v34 = vpop.permute.xlu0 %70 }
  0x9d   :  { %v66_v37 = vpop.permute.xlu1 %65 }
  0xc4   :  { %v1069_v44 = vpop.f32.mrf.mxu0 }
  0xc5   :  { %v268_v38 = vadd.f32 %v1069_v44, %v71_v34  ;;  %v359_v44 = vld [vmem:[%s1118_s3 + $0x10] sm:$0xff] }
  0xc6   :  { %v1071_v45 = vpop.f32.mrf.mxu0 }
  0xc7   :  { %v263_v40 = vadd.f32 %v1071_v45, %v66_v37  ;;  %v342_v42 = vmax.f32 %v268_v38, 0.0  ;;  %v360_v45 = vld [vmem:[%s1118_s3 + $0x18] sm:$0xff] }
  0xc8   :  { %v1073_v46 = vpop.f32.mrf.mxu0 }
  0xc9   :  { %v278_v32 = vadd.f32 %v1073_v46, %v81_v26  ;;  %v341_v43 = vmax.f32 %v263_v40, 0.0  ;;  %v358_v46 = vld [vmem:[%s1118_s3 + $0x8] sm:$0xff] }
  0xca   :  { %v1075_v47 = vpop.f32.mrf.mxu0 }
  0xcb   :  { %v273_v35 = vadd.f32 %v1075_v47, %v76_v29  ;;  %v344_v39 = vmax.f32 %v278_v32, 0.0  ;;  %v361_v47 = vld [vmem:[%s1118_s3 + $0x20] sm:$0xff] }
  0xcc   :  { %v738_v48 = vpop.f32.mrf.mxu0 }
  0xcd   :  { %v288_v27 = vadd.f32 %v738_v48, %v91_v18  ;;  %v343_v41 = vmax.f32 %v273_v35, 0.0  ;;  %v362_v48 = vld [vmem:[%s1118_s3 + $0x28] sm:$0xff] }
  0xce   :  { %v282_v50 = vpop.f32.mrf.mxu0 }
  0xcf   :  { %v283_v30 = vadd.f32 %v282_v50, %v86_v21  ;;  %v346_v33 = vmax.f32 %v288_v27, 0.0  ;;  %v364_v50 = vld [vmem:[%s1118_s3 + $0x38] sm:$0xff] }
  0xd0   :  { %v741_v52 = vpop.f32.mrf.mxu0 }
  0xd1   :  { %v298_v22 = vadd.f32 %v741_v52, %v101_v10  ;;  %v345_v36 = vmax.f32 %v283_v30, 0.0 }
  0xd2   :  { %v292_v53 = vpop.f32.mrf.mxu0 }
  0xd3   :  { %v293_v24 = vadd.f32 %v292_v53, %v96_v13  ;;  %v348_v28 = vmax.f32 %v298_v22, 0.0 }
  0xd4   :  { %v744_v55 = vpop.f32.mrf.mxu0 }
  0xd5   :  { %v308_v16 = vadd.f32 %v744_v55, %v111_v0  ;;  %v347_v31 = vmax.f32 %v293_v24, 0.0 }
  0xd6   :  { %v302_v57 = vpop.f32.mrf.mxu0 }
  0xd7   :  { %v303_v19 = vadd.f32 %v302_v57, %v106_v3  ;;  %v350_v23 = vmax.f32 %v308_v16, 0.0 }
  0xd8   :  { %v747_v58 = vpop.f32.mrf.mxu0 }
  0xd9   :  { %v318_v11 = vadd.f32 %v747_v58, %v121_v59  ;;  %v349_v25 = vmax.f32 %v303_v19, 0.0 }
  0xda   :  { %v312_v60 = vpop.f32.mrf.mxu0 }
  0xdb   :  { %v313_v14 = vadd.f32 %v312_v60, %v116_v61  ;;  %v352_v17 = vmax.f32 %v318_v11, 0.0 }
  0xdc   :  { %v750_v62 = vpop.f32.mrf.mxu0 }
  0xdd   :  { %v328_v5 = vadd.f32 %v750_v62, %v131_v51  ;;  %v351_v20 = vmax.f32 %v313_v14, 0.0  ;;  %v875_v51 = vmov 0.0  }
  0xde   :  { %v322_v63 = vpop.f32.mrf.mxu0  ;;  %798 = vmatprep.subr.mxu0 %v875_v51  ;;  %814 = vmatprep.mubr.msk.f32.mxu0 %vm876_vm2, %v875_v51 }
  0xdf   :  { %v323_v8 = vadd.f32 %v322_v63, %v126_v56  ;;  %v354_v12 = vmax.f32 %v328_v5, 0.0  ;;  %v406_v56 = vpop.permute.xlu1 %405 }
  0xe0   :  { %v753_v1 = vpop.f32.mrf.mxu0 }
  0xe1   :  { %v338_v2 = vadd.f32 %v753_v1, %v141_v49  ;;  %v353_v15 = vmax.f32 %v323_v8, 0.0  ;;  %v363_v49 = vld [vmem:[%s1118_s3 + $0x30] sm:$0xff] }
  0xe2   :  { %v332_v4 = vpop.f32.mrf.mxu0 }
  0xe3   :  { %v356_v6 = vmax.f32 %v338_v2, 0.0  ;;  %v333_v7 = vadd.f32 %v332_v4, %v136_v54  ;;  %v411_v54 = vpop.permute.xlu0 %410  ;;  %v396_v61 = vpop.permute.xlu1 %395 }
  0xe5   :  { %v355_v9 = vmax.f32 %v333_v7, 0.0  ;;  %754 = vmatprep.subr.mxu1 %v356_v6 }
  0xe6   :  { %755 = vmatpush3.msra.mxu1 %v356_v6 }
  0xe7   :  { %756 = vmatprep.subr.mxu1 %v355_v9  ;;  %v401_v59 = vpop.permute.xlu0 %400  ;;  %v386_v7 = vpop.permute.xlu1 %385 }
  0xe8   :  { %757 = vmatpush3.msra.mxu1 %v355_v9 }
  0xe9   :  { %758 = vmatprep.subr.mxu1 %v354_v12 }
  0xea   :  { %759 = vmatpush3.msra.mxu1 %v354_v12 }
  0xeb   :  { %760 = vmatprep.subr.mxu1 %v353_v15  ;;  %v391_v4 = vpop.permute.xlu0 %390 }
  0xec   :  { %761 = vmatpush3.msra.mxu1 %v353_v15  ;;  %v376_v15 = vpop.permute.xlu1 %375 }
  0xed   :  { %762 = vmatprep.subr.mxu1 %v352_v17 }
  0xee   :  { %763 = vmatpush3.msra.mxu1 %v352_v17 }
  0xef   :  { %764 = vmatprep.subr.mxu1 %v351_v20  ;;  %v381_v12 = vpop.permute.xlu0 %380 }
  0xf0   :  { %765 = vmatpush3.msra.mxu1 %v351_v20  ;;  %v526_v20 = vld [vmem:[%s1120_s5] sm:$0x3]  ;;  %s877_s5 = smov [#allocation2]  }
  0xf1   :  { %766 = vmatprep.subr.mxu1 %v350_v23  ;;  %s638_s2 = sshll.u32 %s877_s5, 4  ;;  %s639_s2 = int_to_ptr.vmem [resolvable:$true] %s638_s2 }
  0xf2   :  { %767 = vmatpush3.msra.mxu1 %v350_v23  ;;  %s830_s11 = scalar_lea.vmem %s639_s2, 32  ;;  %p835_p1 = scmp.lt.s32.totalorder %s639_s2, %s639_s2 }
  0xf3   :  { %768 = vmatprep.subr.mxu1 %v349_v25  ;;  %v531_v21 = vpop.permute.xlu0 %530  ;;  %p831_p0 = scmp.ne.s32.totalorder %s639_s2, %s830_s11  ;;  %p836_p2 = scmp.lt.s32.totalorder %s830_s11, %s830_s11 }
  0xf4   :  { %769 = vmatpush3.msra.mxu1 %v349_v25 }
  0xf5   :  { %770 = vmatprep.subr.mxu1 %v348_v28  ;;  %p837_p3 = por %p836_p2, %p835_p1 }
  0xf6   :  { %771 = vmatpush3.msra.mxu1 %v348_v28 }
  0xf7   :  { %772 = vmatprep.subr.mxu1 %v347_v31  ;;  %p838_p4 = pnand %p837_p3, %p831_p0 }
  0xf8   :  { %773 = vmatpush3.msra.mxu1 %v347_v31 }
  0xf9   :  { %774 = vmatprep.subr.mxu1 %v346_v33 }
  0xfa   :  { %775 = vmatpush3.msra.mxu1 %v346_v33 }
  0xfb   :  { %776 = vmatprep.subr.mxu1 %v345_v36 }
  0xfc   :  { %777 = vmatpush3.msra.mxu1 %v345_v36 }
  0xfd   :  { %778 = vmatprep.subr.mxu1 %v344_v39 }
  0xfe   :  { %779 = vmatpush3.msra.mxu1 %v344_v39 }
  0xff   :  { %780 = vmatprep.subr.mxu1 %v343_v41 }
 0x100   :  { %781 = vmatpush3.msra.mxu1 %v343_v41 }
 0x101   :  { %782 = vmatprep.subr.mxu1 %v342_v42 }
 0x102   :  { %783 = vmatpush3.msra.mxu1 %v342_v42 }
 0x103   :  { %784 = vmatprep.subr.mxu1 %v341_v43 }
 0x104   :  { %785 = vmatpush3.msra.mxu1 %v341_v43 }
 0x105   :  { %787 = vmatmul.mubr.f32.vlgmr.msra.gmra.mxu1 %v358_v46 }
 0x106   :  { %789 = vmatprep.mubr.f32.mxu1 %v359_v44 }
 0x109   :  { %790 = vmatmul.mubr.f32.gmra.mxu1 %v360_v45 }
 0x10a   :  { %792 = vmatprep.mubr.f32.mxu1 %v361_v47 }
 0x10d   :  { %793 = vmatmul.mubr.f32.gmra.mxu1 %v362_v48 }
 0x10e   :  { %795 = vmatprep.mubr.f32.mxu1 %v363_v49 }
 0x111   :  { %796 = vmatmul.mubr.f32.gmra.mxu1 %v364_v50 }
 0x1c5   :  { %v788_v52 = vpop.f32.mrf.mxu1 }
 0x1c6   :  { %v485_v13 = vadd.f32 %v788_v52, %v381_v12 }
 0x1c7   :  { %v479_v53 = vpop.f32.mrf.mxu1 }
 0x1c8   :  { %v480_v16 = vadd.f32 %v479_v53, %v376_v15  ;;  %v519_v18 = vmax.f32 %v485_v13, 0.0 }
 0x1c9   :  { %v791_v55 = vpop.f32.mrf.mxu1 }
 0x1ca   :  { %v495_v8 = vadd.f32 %v791_v55, %v391_v4  ;;  %v518_v19 = vmax.f32 %v480_v16, 0.0 }
 0x1cb   :  { %v489_v57 = vpop.f32.mrf.mxu1 }
 0x1cc   :  { %v490_v10 = vadd.f32 %v489_v57, %v386_v7  ;;  %v521_v14 = vmax.f32 %v495_v8, 0.0 }
 0x1cd   :  { %v794_v58 = vpop.f32.mrf.mxu1 }
 0x1ce   :  { %v505_v1 = vadd.f32 %v794_v58, %v401_v59  ;;  %v520_v17 = vmax.f32 %v490_v10, 0.0 }
 0x1cf   :  { %v499_v60 = vpop.f32.mrf.mxu1 }
 0x1d0   :  { %v500_v5 = vadd.f32 %v499_v60, %v396_v61  ;;  %v523_v9 = vmax.f32 %v505_v1, 0.0 }
 0x1d1   :  { %v797_v62 = vpop.f32.mrf.mxu1 }
 0x1d2   :  { %v515_v63 = vadd.f32 %v797_v62, %v411_v54  ;;  %v522_v11 = vmax.f32 %v500_v5, 0.0 }
 0x1d3   :  { %v509_v0 = vpop.f32.mrf.mxu1 }
 0x1d4   :  { %v525_v2 = vmax.f32 %v515_v63, 0.0  ;;  %v510_v3 = vadd.f32 %v509_v0, %v406_v56 }
 0x1d6   :  { %v524_v6 = vmax.f32 %v510_v3, 0.0  ;;  %799 = vmatpush3.msra.mxu0 %v525_v2 }
 0x1d7   :  { %800 = vmatprep.subr.mxu0 %v875_v51 }
 0x1d8   :  { %801 = vmatpush3.msra.mxu0 %v524_v6 }
 0x1d9   :  { %802 = vmatprep.subr.mxu0 %v875_v51 }
 0x1da   :  { %803 = vmatpush3.msra.mxu0 %v523_v9 }
 0x1db   :  { %804 = vmatprep.subr.mxu0 %v875_v51 }
 0x1dc   :  { %805 = vmatpush3.msra.mxu0 %v522_v11 }
 0x1dd   :  { %806 = vmatprep.subr.mxu0 %v875_v51 }
 0x1de   :  { %807 = vmatpush3.msra.mxu0 %v521_v14 }
 0x1df   :  { %808 = vmatprep.subr.mxu0 %v875_v51 }
 0x1e0   :  { %809 = vmatpush3.msra.mxu0 %v520_v17 }
 0x1e1   :  { %810 = vmatprep.subr.mxu0 %v875_v51 }
 0x1e2   :  { %811 = vmatpush3.msra.mxu0 %v519_v18 }
 0x1e3   :  { %812 = vmatprep.subr.mxu0 %v875_v51 }
 0x1e4   :  { %813 = vmatpush3.msra.mxu0 %v518_v19 }
 0x1e5   :  { %815 = vmatmul.mubr.msk.f32.vlgmr.msra.gmra.mxu0 %vm533_vm3, %v526_v20 }
 0x2a5   :  { %v603_v22 = vpop.f32.mrf.mxu0 }
 0x2a6   :  { %v604_v23 = vadd.f32 %v603_v22, %v531_v21 }
 0x2a7   :  { %v816_v24 = vpop.f32.mrf.mxu0 }
 0x2a8   :  { %v608_v25 = vsel %vm607_vm4, %v604_v23, -inf }
 0x2a9   :  { %v609_v26 = vrot.slane %v608_v25, 4 }
 0x2ab   :  { %v610_v27 = vmax.f32 %v608_v25, %v609_v26 }
 0x2ad   :  { %v611_v28 = vrot.slane %v610_v27, 2 }
 0x2af   :  { %v612_v29 = vmax.f32 %v610_v27, %v611_v28 }
 0x2b1   :  { %v613_v30 = vrot.slane %v612_v29, 1 }
 0x2b3   :  { %v614_v31 = vmax.f32 %v612_v29, %v613_v30 }
 0x2b5   :  { %v615_v32 = vsub.f32 %v604_v23, %v614_v31 }
 0x2b7   :  { %v616_v33 = vmul.f32 1.442695, %v615_v32 }
 0x2b9   :  { %824 = vpow2.f32 %v616_v33 }
 0x2c6   :  { %v825_v34 = vpop.eup %824 }
 0x2c7   :  { %v618_v35 = vsel %vm607_vm4, %v825_v34, 0.0 }
 0x2c8   :  { %v619_v36 = vrot.slane %v618_v35, 4 }
 0x2ca   :  { %v620_v37 = vadd.f32 %v619_v36, %v618_v35 }
 0x2cc   :  { %v621_v38 = vrot.slane %v620_v37, 2 }
 0x2ce   :  { %v622_v39 = vadd.f32 %v621_v38, %v620_v37 }
 0x2d0   :  { %v623_v40 = vrot.slane %v622_v39, 1 }
 0x2d2   :  { %v624_v41 = vadd.f32 %v623_v40, %v622_v39 }
 0x2d4   :  { %826 = vrcp.f32 %v624_v41 }
 0x2d5   :  { %828 = vlog2.f32 %v624_v41 }
 0x2e1   :  { %v827_v42 = vpop.eup %826 }
 0x2e2   :  { %v829_v43 = vpop.eup %828  ;;  %v630_v46 = vmul.f32 %v827_v42, %v825_v34 }
 0x2e3   :  { %v626_v44 = vmul.f32 0.6931472, %v829_v43 }
 0x2e4   :  { %631 = vst.msk [vmem:[#allocation2] sm:$0x3] %vm607_vm4, %v630_v46 }
 0x2e5   :  { %841 = shalt.err (!%p838_p4)
}
 0x2e6   :  { %641 = dma.vmem_to_hbm [thread:$0]  %s639_s2, 32, %s1122_s7, [#allocation3]   ;;  %v628_v45 = vsub.f32 %v615_v32, %v626_v44 }
 0x2e7   :  { %s850_s13 = scalar_lea.vmem %s649_s10, 32  ;;  %p855_p6 = scmp.lt.s32.totalorder %s649_s10, %s649_s10 }
 0x2e8   :  { %629 = vst.msk [vmem:[#allocation4] sm:$0x3] %vm607_vm4, %v628_v45  ;;  %p851_p5 = scmp.ne.s32.totalorder %s649_s10, %s850_s13  ;;  %p856_p7 = scmp.lt.s32.totalorder %s850_s13, %s850_s13 }
 0x2ea   :  { %p857_p8 = por %p856_p7, %p855_p6 }
 0x2ec   :  { %p858_p9 = pnand %p857_p8, %p851_p5 }
 0x2ee   :  { %861 = shalt.err (!%p858_p9)
}
 0x2ef   :  { %651 = dma.vmem_to_hbm [thread:$0]  %s649_s10, 32, %s1123_s8, [#allocation5]  }
 0x2f0   :  { %870 = dma.done.wait [#allocation3], 32  }
 0x2f1   :  { %871 = vsyncadd [#allocation3], 4294967264 }
 0x2f2   :  { %872 = dma.done.wait [#allocation5], 32  }
 0x2f3   :  { %873 = vsyncadd [#allocation5], 4294967264 }
 0x2f4   :  { %658 = vsyncpa [#allocation3], 1 }
 0x2f5   :  { %659 = vsyncpa [#allocation5], 1 }

</bundles_post_ra>
